<compile_context>
chip_gen: v7x
topology: tpu7x:2x2x1
jax: 0.10.0
libtpu: 0.0.40
codegen_flags: <defaults>
</compile_context>

<pallas_src>
import functools

import jax
import jax.numpy as jnp
from jax import lax
from jax.experimental import pallas as pl
from jax.experimental.pallas import tpu as pltpu


def _attention_kernel(x_ref, w_ref, o_ref, *, num_heads, scale, compute_dtype):
    """One batch element, all heads fused.

    x_ref: (N, C)   w_ref: (3, H, C, D)   o_ref: (N, C)
    """
    x = x_ref[...].astype(compute_dtype)                                 # (N, C)

    head_outs = []
    for h in range(num_heads):
        wq = w_ref[0, h].astype(compute_dtype)                           # (C, D)
        wk = w_ref[1, h].astype(compute_dtype)
        wv = w_ref[2, h].astype(compute_dtype)

        # Projections: operands in compute_dtype, f32 accumulation on the MXU.
        q = jnp.dot(x, wq, preferred_element_type=jnp.float32) * scale  # (N, D)
        k = jnp.dot(x, wk, preferred_element_type=jnp.float32)          # (N, D)
        v = jnp.dot(x, wv, preferred_element_type=jnp.float32)          # (N, D)

        # q @ k^T without materializing a transpose: contract the D axis.
        s = lax.dot_general(
            q.astype(compute_dtype), k.astype(compute_dtype),
            dimension_numbers=(((1,), (1,)), ((), ())),
            preferred_element_type=jnp.float32)                          # (N, N)

        # Softmax in f32 (numerics; v5e has no bf16 VPU/EUP).
        s = s - jnp.max(s, axis=-1, keepdims=True)
        p = jnp.exp(s)
        p = p * pl.reciprocal(jnp.sum(p, axis=-1, keepdims=True), approx=True)
        # TODO(synk): attention dropout (attn_drop) omitted — identity in eval.

        o = jnp.dot(p.astype(compute_dtype), v.astype(compute_dtype),
                    preferred_element_type=jnp.float32)                  # (N, D)
        head_outs.append(o)

    out = head_outs[0] if num_heads == 1 else jnp.concatenate(head_outs, axis=-1)
    o_ref[...] = out.astype(o_ref.dtype)            # single (N, C)-wide store


def prepare_qkv_weight(qkv_weight, num_heads):
    """(3C, C) nn.Linear weight -> (3, H, C, D).  Call ONCE at init time."""
    three_c, c = qkv_weight.shape
    assert three_c == 3 * c
    d = c // num_heads
    # nn.Linear: y = x @ W.T ; columns of y (size 3C) map to (3, H, D).
    w_t = qkv_weight.T.reshape(c, 3, num_heads, d)        # (C, 3, H, D)
    return jnp.transpose(w_t, (1, 2, 0, 3))               # (3, H, C, D)


def attention_forward(x, w_heads, *, compute_dtype=jnp.float32):
    """x: (B, N, C) float32; w_heads: (3, H, C, D) from prepare_qkv_weight."""
    B, N, C = x.shape
    _, H, _, D = w_heads.shape
    scale = float(D) ** -0.5

    x2d = x.reshape(B * N, C)                              # free row-major view

    kernel = functools.partial(
        _attention_kernel, num_heads=H, scale=scale, compute_dtype=compute_dtype)

    out2d = pl.pallas_call(
        kernel,
        out_shape=jax.ShapeDtypeStruct((B * N, C), x.dtype),
        grid_spec=pltpu.PrefetchScalarGridSpec(
            num_scalar_prefetch=0,
            grid=(B,),
            in_specs=[
                pl.BlockSpec((N, C), lambda b: (b, 0)),              # x rows of batch b
                pl.BlockSpec((3, H, C, D), lambda b: (0, 0, 0, 0)),  # all weights
            ],
            out_specs=pl.BlockSpec((N, C), lambda b: (b, 0)),
        ),
        compiler_params=pltpu.CompilerParams(
            dimension_semantics=("parallel",)),
    )(x2d, w_heads)
    return out2d.reshape(B, N, C)


def _reference(x, qkv_weight, num_heads=2):
    B, N, C = x.shape
    H = num_heads
    D = C // H
    scale = float(D) ** -0.5
    qkv = x @ qkv_weight.T                                   # (B, N, 3C)
    qkv = qkv.reshape(B, N, 3, H, D).transpose(2, 0, 3, 1, 4)
    q, k, v = qkv[0], qkv[1], qkv[2]                         # (B, H, N, D)
    attn = jnp.einsum("bhnd,bhmd->bhnm", q, k) * scale
    attn = jax.nn.softmax(attn, axis=-1)
    out = jnp.einsum("bhnm,bhmd->bhnd", attn, v)
    return out.transpose(0, 2, 1, 3).reshape(B, N, C)


if __name__ == "__main__":
    B, N, C, H = 2, 8, 32, 2

    key = jax.random.PRNGKey(0)
    kx, kw = jax.random.split(key)
    x = jax.random.normal(kx, (B, N, C), dtype=jnp.float32)
    qkv_weight = jax.random.normal(kw, (3 * C, C), dtype=jnp.float32) * 0.05

    # Weight relayout hoisted out of the forward path (done once).
    w_heads = prepare_qkv_weight(qkv_weight, num_heads=H)

    ref = _reference(x, qkv_weight, num_heads=H)

    # f32 path (exact module semantics; softmax denom via approx reciprocal).
    out = jax.block_until_ready(attention_forward(x, w_heads))
    assert out.shape == (B, N, C)
    assert jnp.allclose(out, ref, atol=1e-3, rtol=1e-3)

    # bf16 MXU path (v6e / v7x friendly): bf16 matmul operands, f32 softmax.
    out_bf16 = jax.block_until_ready(
        attention_forward(x, w_heads, compute_dtype=jnp.bfloat16))
    assert out_bf16.shape == (B, N, C)
    assert jnp.allclose(out_bf16, ref, atol=5e-2, rtol=5e-2)

    print("KERNEL_OK")
</pallas_src>

<mosaic_0001>
module attributes {stable_mosaic.version = 11 : i64} {
  func.func @_attention_kernel(%arg0: i32, %arg1: memref<8x32xf32, #tpu.memory_space<vmem>>, %arg2: memref<3x2x32x16xf32, #tpu.memory_space<vmem>>, %arg3: memref<8x32xf32, #tpu.memory_space<vmem>>) attributes {dimension_semantics = [#tpu.dimension_semantics<parallel>], iteration_bounds = array<i64: 2>, scalar_prefetch = 0 : i64, scratch_operands = 0 : i64, tpu.core_type = #tpu.core_type<tc>, window_params = [{transform_indices = @transform_0, window_bounds = array<i64: 8, 32>}, {pipeline_mode = #tpu.pipeline_mode<synchronous>, transform_indices = @transform_1, window_bounds = array<i64: 3, 2, 32, 16>}, {transform_indices = @transform_2, window_bounds = array<i64: 8, 32>}]} {
    %c0 = arith.constant 0 : index
    %c0_0 = arith.constant 0 : index
    %0 = vector.load %arg1[%c0, %c0_0] : memref<8x32xf32, #tpu.memory_space<vmem>>, vector<8x32xf32>
    %c0_1 = arith.constant 0 : index
    %c0_2 = arith.constant 0 : index
    %c0_3 = arith.constant 0 : index
    %c0_4 = arith.constant 0 : index
    %1 = vector.load %arg2[%c0_1, %c0_2, %c0_3, %c0_4] : memref<3x2x32x16xf32, #tpu.memory_space<vmem>>, vector<1x1x32x16xf32>
    %2 = vector.shape_cast %1 : vector<1x1x32x16xf32> to vector<32x16xf32>
    %c1 = arith.constant 1 : index
    %c0_5 = arith.constant 0 : index
    %c0_6 = arith.constant 0 : index
    %c0_7 = arith.constant 0 : index
    %3 = vector.load %arg2[%c1, %c0_5, %c0_6, %c0_7] : memref<3x2x32x16xf32, #tpu.memory_space<vmem>>, vector<1x1x32x16xf32>
    %4 = vector.shape_cast %3 : vector<1x1x32x16xf32> to vector<32x16xf32>
    %c2 = arith.constant 2 : index
    %c0_8 = arith.constant 0 : index
    %c0_9 = arith.constant 0 : index
    %c0_10 = arith.constant 0 : index
    %5 = vector.load %arg2[%c2, %c0_8, %c0_9, %c0_10] : memref<3x2x32x16xf32, #tpu.memory_space<vmem>>, vector<1x1x32x16xf32>
    %6 = vector.shape_cast %5 : vector<1x1x32x16xf32> to vector<32x16xf32>
    %cst = arith.constant dense<0.000000e+00> : vector<8x16xf32>
    %7 = tpu.matmul %0, %2, %cst {dimension_numbers = #tpu.dot_dimension_numbers<[1], [0], [0], [1], [0, 0, 1, 1], [], []>} : vector<8x32xf32>, vector<32x16xf32>, vector<8x16xf32> -> vector<8x16xf32>
    %cst_11 = arith.constant 2.500000e-01 : f32
    %8 = vector.broadcast %cst_11 : f32 to vector<8x16xf32>
    %9 = arith.mulf %7, %8 : vector<8x16xf32>
    %cst_12 = arith.constant dense<0.000000e+00> : vector<8x16xf32>
    %10 = tpu.matmul %0, %4, %cst_12 {dimension_numbers = #tpu.dot_dimension_numbers<[1], [0], [0], [1], [0, 0, 1, 1], [], []>} : vector<8x32xf32>, vector<32x16xf32>, vector<8x16xf32> -> vector<8x16xf32>
    %cst_13 = arith.constant dense<0.000000e+00> : vector<8x16xf32>
    %11 = tpu.matmul %0, %6, %cst_13 {dimension_numbers = #tpu.dot_dimension_numbers<[1], [0], [0], [1], [0, 0, 1, 1], [], []>} : vector<8x32xf32>, vector<32x16xf32>, vector<8x16xf32> -> vector<8x16xf32>
    %cst_14 = arith.constant dense<0.000000e+00> : vector<8x8xf32>
    %12 = tpu.matmul %9, %10, %cst_14 {dimension_numbers = #tpu.dot_dimension_numbers<[1], [1], [0], [0], [0, 0, 1, 0], [], []>} : vector<8x16xf32>, vector<8x16xf32>, vector<8x8xf32> -> vector<8x8xf32>
    %cst_15 = arith.constant dense<0xFF800000> : vector<8xf32>
    %13 = vector.multi_reduction <maximumf>, %12, %cst_15 [1] : vector<8x8xf32> to vector<8xf32>
    %14 = vector.shape_cast %13 : vector<8xf32> to vector<8x1xf32>
    %15 = vector.broadcast %14 : vector<8x1xf32> to vector<8x8xf32>
    %16 = arith.subf %12, %15 : vector<8x8xf32>
    %17 = math.exp %16 : vector<8x8xf32>
    %cst_16 = arith.constant dense<0.000000e+00> : vector<8xf32>
    %18 = vector.multi_reduction <add>, %17, %cst_16 [1] : vector<8x8xf32> to vector<8xf32>
    %19 = vector.shape_cast %18 : vector<8xf32> to vector<8x1xf32>
    %20 = tpu.reciprocal %19 {approx = true} : vector<8x1xf32> -> vector<8x1xf32>
    %21 = vector.broadcast %20 : vector<8x1xf32> to vector<8x8xf32>
    %22 = arith.mulf %17, %21 : vector<8x8xf32>
    %cst_17 = arith.constant dense<0.000000e+00> : vector<8x16xf32>
    %23 = tpu.matmul %22, %11, %cst_17 {dimension_numbers = #tpu.dot_dimension_numbers<[1], [0], [0], [1], [0, 0, 1, 1], [], []>} : vector<8x8xf32>, vector<8x16xf32>, vector<8x16xf32> -> vector<8x16xf32>
    %c0_18 = arith.constant 0 : index
    %c1_19 = arith.constant 1 : index
    %c0_20 = arith.constant 0 : index
    %c0_21 = arith.constant 0 : index
    %24 = vector.load %arg2[%c0_18, %c1_19, %c0_20, %c0_21] : memref<3x2x32x16xf32, #tpu.memory_space<vmem>>, vector<1x1x32x16xf32>
    %25 = vector.shape_cast %24 : vector<1x1x32x16xf32> to vector<32x16xf32>
    %c1_22 = arith.constant 1 : index
    %c1_23 = arith.constant 1 : index
    %c0_24 = arith.constant 0 : index
    %c0_25 = arith.constant 0 : index
    %26 = vector.load %arg2[%c1_22, %c1_23, %c0_24, %c0_25] : memref<3x2x32x16xf32, #tpu.memory_space<vmem>>, vector<1x1x32x16xf32>
    %27 = vector.shape_cast %26 : vector<1x1x32x16xf32> to vector<32x16xf32>
    %c2_26 = arith.constant 2 : index
    %c1_27 = arith.constant 1 : index
    %c0_28 = arith.constant 0 : index
    %c0_29 = arith.constant 0 : index
    %28 = vector.load %arg2[%c2_26, %c1_27, %c0_28, %c0_29] : memref<3x2x32x16xf32, #tpu.memory_space<vmem>>, vector<1x1x32x16xf32>
    %29 = vector.shape_cast %28 : vector<1x1x32x16xf32> to vector<32x16xf32>
    %cst_30 = arith.constant dense<0.000000e+00> : vector<8x16xf32>
    %30 = tpu.matmul %0, %25, %cst_30 {dimension_numbers = #tpu.dot_dimension_numbers<[1], [0], [0], [1], [0, 0, 1, 1], [], []>} : vector<8x32xf32>, vector<32x16xf32>, vector<8x16xf32> -> vector<8x16xf32>
    %cst_31 = arith.constant 2.500000e-01 : f32
    %31 = vector.broadcast %cst_31 : f32 to vector<8x16xf32>
    %32 = arith.mulf %30, %31 : vector<8x16xf32>
    %cst_32 = arith.constant dense<0.000000e+00> : vector<8x16xf32>
    %33 = tpu.matmul %0, %27, %cst_32 {dimension_numbers = #tpu.dot_dimension_numbers<[1], [0], [0], [1], [0, 0, 1, 1], [], []>} : vector<8x32xf32>, vector<32x16xf32>, vector<8x16xf32> -> vector<8x16xf32>
    %cst_33 = arith.constant dense<0.000000e+00> : vector<8x16xf32>
    %34 = tpu.matmul %0, %29, %cst_33 {dimension_numbers = #tpu.dot_dimension_numbers<[1], [0], [0], [1], [0, 0, 1, 1], [], []>} : vector<8x32xf32>, vector<32x16xf32>, vector<8x16xf32> -> vector<8x16xf32>
    %cst_34 = arith.constant dense<0.000000e+00> : vector<8x8xf32>
    %35 = tpu.matmul %32, %33, %cst_34 {dimension_numbers = #tpu.dot_dimension_numbers<[1], [1], [0], [0], [0, 0, 1, 0], [], []>} : vector<8x16xf32>, vector<8x16xf32>, vector<8x8xf32> -> vector<8x8xf32>
    %cst_35 = arith.constant dense<0xFF800000> : vector<8xf32>
    %36 = vector.multi_reduction <maximumf>, %35, %cst_35 [1] : vector<8x8xf32> to vector<8xf32>
    %37 = vector.shape_cast %36 : vector<8xf32> to vector<8x1xf32>
    %38 = vector.broadcast %37 : vector<8x1xf32> to vector<8x8xf32>
    %39 = arith.subf %35, %38 : vector<8x8xf32>
    %40 = math.exp %39 : vector<8x8xf32>
    %cst_36 = arith.constant dense<0.000000e+00> : vector<8xf32>
    %41 = vector.multi_reduction <add>, %40, %cst_36 [1] : vector<8x8xf32> to vector<8xf32>
    %42 = vector.shape_cast %41 : vector<8xf32> to vector<8x1xf32>
    %43 = tpu.reciprocal %42 {approx = true} : vector<8x1xf32> -> vector<8x1xf32>
    %44 = vector.broadcast %43 : vector<8x1xf32> to vector<8x8xf32>
    %45 = arith.mulf %40, %44 : vector<8x8xf32>
    %cst_37 = arith.constant dense<0.000000e+00> : vector<8x16xf32>
    %46 = tpu.matmul %45, %34, %cst_37 {dimension_numbers = #tpu.dot_dimension_numbers<[1], [0], [0], [1], [0, 0, 1, 1], [], []>} : vector<8x8xf32>, vector<8x16xf32>, vector<8x16xf32> -> vector<8x16xf32>
    %47 = tpu.concatenate %23, %46 in 1 : vector<8x16xf32>, vector<8x16xf32> -> vector<8x32xf32>
    %c0_38 = arith.constant 0 : index
    %c0_39 = arith.constant 0 : index
    %48 = vector.load %arg3[%c0_38, %c0_39] : memref<8x32xf32, #tpu.memory_space<vmem>>, vector<8x32xf32>
    tpu.vector_store %arg3[%c0_38, %c0_39], %47 {strides = array<i32>} : memref<8x32xf32, #tpu.memory_space<vmem>>, vector<8x32xf32>,
    return
  }
  func.func @transform_0(%arg0: i32) -> (i32, i32) {
    %c0_i32 = arith.constant 0 : i32
    %c0_i32_0 = arith.constant 0 : i32
    return %arg0, %c0_i32 : i32, i32
  }
  func.func @transform_1(%arg0: i32) -> (i32, i32, i32, i32) {
    %c0_i32 = arith.constant 0 : i32
    %c0_i32_0 = arith.constant 0 : i32
    %c0_i32_1 = arith.constant 0 : i32
    %c0_i32_2 = arith.constant 0 : i32
    %c0_i32_3 = arith.constant 0 : i32
    return %c0_i32, %c0_i32_0, %c0_i32_1, %c0_i32_2 : i32, i32, i32, i32
  }
  func.func @transform_2(%arg0: i32) -> (i32, i32) {
    %c0_i32 = arith.constant 0 : i32
    %c0_i32_0 = arith.constant 0 : i32
    return %arg0, %c0_i32 : i32, i32
  }
}

</mosaic_0001>

<bundles_post_ra>
// kernel: tpu_custom_call.1
= control target key start
LH: loop header
LB: loop body
LE: loop exit
PB: predicated region body
PF: predicated region fallthrough
CT: control target
= control target key end

     0   :  { %7 = vsyncpa [#allocation3], 0  ;;  %s1567_s0 = inlined_call_operand.vmem [shape: f32[16,32], index: 0, kind: input, shape index: {}]   ;;  %s1568_s1 = inlined_call_operand.vmem [shape: f32[3,2,32,16], index: 1, kind: input, shape index: {}]   ;;  %s1569_s2 = inlined_call_operand.hbm [shape: f32[16,32], index: 2, kind: output, shape index: {}]  }
   0x1   :  { %9 = vsyncpa [#allocation3 + $0x1], 0  ;;  %s1333_s9 = smov 0   ;;  %s1335_s10 = smov 0  }
   0x2   :  { %s1337_s11 = smov 0   ;;  %s1339_s12 = smov 0  }
   0x3 LB: > { %s1354_s13 = sadd.s32 4294967295, %s1311_s12   ;;  %s996_s14 = sadd.s32 4294967294, %s1311_s12   ;;  %s1311_s12 = sphi %s1339_s12, %s1575_s12   ;;  %s1307_s11 = sphi %s1337_s11, %s1574_s11   ;;  %s1303_s10 = sphi %s1335_s10, %s1573_s10   ;;  %s1299_s9 = sphi %s1333_s9, %s1572_s9  }
   0x4   : > { %s1358_s15 = sadd.s32 1, %s1311_s12   ;;  %s69_s16 = sadd.s32 1, %s1307_s11 }
   0x5   : > { %s66_s17 = ssub.s32 %s1311_s12, %s1358_s15  ;;  %p79_p0 = scmp.ne.s32.totalorder %s1307_s11, %s1303_s10 }
   0x6   : > { %p67_p1 = scmp.eq.s32.totalorder %s66_s17, 0  ;;  %p80_p2 = scmp.eq.s32.totalorder %s1354_s13, 1 }
   0x7   : > { %p85_p3 = scmp.ne.s32.totalorder %s1303_s10, %s1299_s9  ;;  %p86_p4 = scmp.eq.s32.totalorder %s996_s14, 1 }
   0x8   : > { %s1369_s18 = scalar_select %p67_p1, %s1307_s11, %s69_s16  }
   0x9   : > { %p1371_p5 = por %p80_p2, %p79_p0  ;;  %p1375_p6 = por %p86_p4, %p85_p3 }
   0xa   : > { %p999_p7 = scmp.ge.s32.totalorder %s1311_s12, 1  ;;  %p114_p8 = scmp.lt.s32.totalorder %s1311_s12, 3 }
   0xc   : > { %p115_p9 = pnand %p999_p7, %p114_p8 }
   0xd   : > { %v140_v0 = vld [vmem:[%s1568_s1] sm:$0xff] (!%p115_p9)  ;;  %v141_v1 = vld [vmem:[%s1568_s1 + $0x8] sm:$0xff] (!%p115_p9)  ;;  %v1313_v3 = vmov (!%p115_p9), 0.0|0.0   ;;  %v142_v6 = vld [vmem:[%s1568_s1 + $0x10] sm:$0xff] (!%p115_p9)  ;;  %p135_p10 = scmp.lt.s32.totalorder (!%p115_p9), %s1354_s13, 1  ;;  %vm1314_vm0 = vmmov (!%p115_p9), 0  }
   0xe   : > { %118 = sbr.rel (%p115_p9) target bundleno = 1858 (0x742), region = 28  ;;  %v1002_v2 = vld [vmem:[%s1568_s1 + $0x40] sm:$0xff] (!%p115_p9)  ;;  %1162 = vmatprep.subr.bf16.mxu0 (!%p115_p9), %v1313_v3  ;;  %1168 = vmatprep.subr.bf16.mxu1 (!%p115_p9), %v1313_v3  ;;  %v1163_v4 = vpack.c.bf16 (!%p115_p9), %v141_v1, %v140_v0  ;;  %v1003_v5 = vld [vmem:[%s1568_s1 + $0x48] sm:$0xff] (!%p115_p9)  ;;  %v143_v7 = vld [vmem:[%s1568_s1 + $0x18] sm:$0xff] (!%p115_p9)  ;;  %v1315_v11 = vmov (!%p115_p9), 0.0   ;;  %vm154_vm1 = vcmask (!%p115_p9), 261120  }
   0xf   : > { %v1169_v8 = vpack.c.bf16 (!%p115_p9), %v1003_v5, %v1002_v2  ;;  %v1004_v9 = vld [vmem:[%s1568_s1 + $0x50] sm:$0xff] (!%p115_p9)  ;;  %v1005_v10 = vld [vmem:[%s1568_s1 + $0x58] sm:$0xff] (!%p115_p9)  ;;  %1084 = vmatprep.mubr.msk.f32.mxu0 (!%p115_p9), %vm1314_vm0, %v1315_v11  ;;  %1095 = vmatprep.mubr.msk.f32.mxu1 (!%p115_p9), %vm1314_vm0, %v1315_v11  ;;  %v1166_v12 = vpack.c.bf16 (!%p115_p9), %v143_v7, %v142_v6  ;;  %vm369_vm2 = vcmask (!%p115_p9), 130048   ;;  %v1006_v20 = vld [vmem:[%s1568_s1 + $0x80] sm:$0xff] (!%p115_p9)  ;;  %vm446_vm3 = vcmask (!%p115_p9), 64512   ;;  %s1316_s8 = smov (!%p115_p9), 16  }
  0x10   : > { %1164 = vmatpush3.bf16.msra.mxu0 (!%p115_p9), %v1163_v4  ;;  %v1172_v13 = vpack.c.bf16 (!%p115_p9), %v1005_v10, %v1004_v9  ;;  %v1007_v21 = vld [vmem:[%s1568_s1 + $0x88] sm:$0xff] (!%p115_p9)  ;;  %v1008_v22 = vld [vmem:[%s1568_s1 + $0x90] sm:$0xff] (!%p115_p9)  ;;  %v1009_v24 = vld [vmem:[%s1568_s1 + $0x98] sm:$0xff] (!%p115_p9)  ;;  %s1035_s17 = sshll.u32 (!%p115_p9), %s1354_s13, 7 }
  0x11   : > { %1170 = vmatpush3.bf16.msra.mxu1 (!%p115_p9), %v1169_v8  ;;  %1165 = vmatprep.subr.bf16.mxu0 (!%p115_p9), %v1313_v3  ;;  %v1175_v23 = vpack.c.bf16 (!%p115_p9), %v1007_v21, %v1006_v20  ;;  %v1178_v25 = vpack.c.bf16 (!%p115_p9), %v1009_v24, %v1008_v22  ;;  %v1016_v36 = vld [vmem:[%s1568_s1 + $0x20] sm:$0xff] (!%p115_p9)  ;;  %v1017_v37 = vld [vmem:[%s1568_s1 + $0x28] sm:$0xff] (!%p115_p9)  ;;  %v1018_v39 = vld [vmem:[%s1568_s1 + $0x30] sm:$0xff] (!%p115_p9)  ;;  %s1523_s25 = scalar_lea.hbm (!%p115_p9), %s1569_s2, %s1035_s17 }
  0x12   : > { %1171 = vmatprep.subr.bf16.mxu1 (!%p115_p9), %v1313_v3  ;;  %v1181_v38 = vpack.c.bf16 (!%p115_p9), %v1017_v37, %v1016_v36  ;;  %v1019_v40 = vld [vmem:[%s1568_s1 + $0x38] sm:$0xff] (!%p115_p9)  ;;  %v1020_v43 = vld [vmem:[%s1568_s1 + $0x60] sm:$0xff] (!%p115_p9)  ;;  %v1021_v44 = vld [vmem:[%s1568_s1 + $0x68] sm:$0xff] (!%p115_p9) }
  0x13   : > { %v1184_v41 = vpack.c.bf16 (!%p115_p9), %v1019_v40, %v1018_v39  ;;  %v1187_v46 = vpack.c.bf16 (!%p115_p9), %v1021_v44, %v1020_v43  ;;  %v1022_v48 = vld [vmem:[%s1568_s1 + $0x70] sm:$0xff] (!%p115_p9)  ;;  %v1023_v49 = vld [vmem:[%s1568_s1 + $0x78] sm:$0xff] (!%p115_p9)  ;;  %v1024_v58 = vld [vmem:[%s1568_s1 + $0xa0] sm:$0xff] (!%p115_p9) }
  0x14   : > { %1167 = vmatpush3.bf16.msra.mxu0 (!%p115_p9), %v1166_v12  ;;  %v1190_v50 = vpack.c.bf16 (!%p115_p9), %v1023_v49, %v1022_v48  ;;  %v1025_v59 = vld [vmem:[%s1568_s1 + $0xa8] sm:$0xff] (!%p115_p9)  ;;  %v1026_v60 = vld [vmem:[%s1568_s1 + $0xb0] sm:$0xff] (!%p115_p9)  ;;  %v1027_v62 = vld [vmem:[%s1568_s1 + $0xb8] sm:$0xff] (!%p115_p9) }
  0x15   : > { %s136_s14 = scalar_select %p135_p10, %s1354_s13, 1  ;;  %1173 = vmatpush3.bf16.msra.mxu1 %v1172_v13  ;;  %1174 = vmatprep.subr.bf16.mxu0 %v1313_v3  ;;  %v1193_v61 = vpack.c.bf16 %v1025_v59, %v1024_v58  ;;  %v1196_v63 = vpack.c.bf16 %v1027_v62, %v1026_v60 }
  0x16   : > { %1109 = vmatprep.subr.mxu1 %v1315_v11  ;;  %s1317_s13 = smov [#allocation2]  }
  0x17   : > { %s1001_s16 = sshll.u32 %s136_s14, 3  ;;  %s132_s14 = sand.u32 1, %s1303_s10  }
  0x18   : > { %s138_s22 = scalar_lea.vmem %s1567_s0, %s1001_s16  ;;  %s1000_s16 = sshll.u32 %s132_s14, 3 }
  0x19   : > { %v1418_v14 = vld [vmem:[%s138_s22] sm:$0xff]  ;;  %s134_s21 = scalar_lea.vmem [#allocation2], %s1000_s16  ;;  %s924_s26 = scalar_lea.sflag [#allocation3], %s132_s14 }
  0x1a   : > { %1085 = vmatmul.mubr.msk.f32.vlgmr.msra.gmra.mrb[0].mxu0 %vm154_vm1, %v1418_v14  ;;  %1096 = vmatmul.mubr.msk.f32.vlgmr.msra.gmra.mrb[0].mxu1 %vm154_vm1, %v1418_v14  ;;  %s937_s22 = sshll.u32 %s134_s21, 4  ;;  %s1253_s28 = sshll.u32 %s1317_s13, 4  ;;  %s1525_s22 = int_to_ptr.vmem [resolvable:$true] %s937_s22  ;;  %s1254_s28 = int_to_ptr.vmem [resolvable:$false] %s1253_s28 }
  0x1b   : > { %1106 = vmatprep.mubr.msk.f32.mxu0 %vm1314_vm0, %v1315_v11  ;;  %1111 = vmatprep.mubr.msk.f32.mxu1 %vm1314_vm0, %v1315_v11  ;;  %s1249_s27 = scalar_lea.vmem %s1525_s22, 128  ;;  %s1255_s29 = scalar_lea.vmem %s1254_s28, 256 }
  0x1c   : > { %1176 = vmatpush3.bf16.msra.mxu0 %v1175_v23  ;;  %p1250_p11 = scmp.ne.s32.totalorder %s1525_s22, %s1249_s27  ;;  %p1256_p0 = scmp.lt.s32.totalorder %s1525_s22, %s1254_s28 }
  0x1d   : > { %1177 = vmatprep.subr.bf16.mxu0 %v1313_v3  ;;  %p1257_p1 = scmp.lt.s32.totalorder %s1255_s29, %s1249_s27 }
  0x1e   : > { %p1251_p12 = pnand %p1250_p11, %p1371_p5 }
  0x1f   : > { %p1258_p2 = por %p1257_p1, %p1256_p0 }
  0x20   : > { %1179 = vmatpush3.bf16.msra.mxu0 %v1178_v25  ;;  %p1252_p13 = pneg %p1251_p12 }
  0x21   : > { %1180 = vmatprep.subr.bf16.mxu0 %v1313_v3 }
  0x22   : > { %p1259_p3 = pnand %p1258_p2, %p1252_p13 }
  0x23   : > { %1107 = vmatmul.mubr.msk.f32.vlgmr.msra.gmra.mrb[2].mxu0 %vm154_vm1, %v1418_v14 }
  0x24   : > { %1127 = vmatprep.mubr.msk.f32.mxu0 %vm1314_vm0, %v1315_v11  ;;  %1182 = vmatpush3.bf16.msra.mxu0 %v1181_v38 }
  0x25   : > { %1183 = vmatprep.subr.bf16.mxu0 %v1313_v3 }
  0x28   : > { %1185 = vmatpush3.bf16.msra.mxu0 %v1184_v41 }
  0x29   : > { %1192 = vmatprep.subr.bf16.mxu0 %v1313_v3 }
  0x2b   : > { %1128 = vmatmul.mubr.msk.f32.vlgmr.msra.gmra.mrb[4].mxu0 %vm154_vm1, %v1418_v14 }
  0x2c   : > { %1149 = vmatprep.mubr.msk.f32.mxu0 %vm1314_vm0, %v1315_v11  ;;  %1194 = vmatpush3.bf16.msra.mxu0 %v1193_v61 }
  0x2d   : > { %1195 = vmatprep.subr.bf16.mxu0 %v1313_v3 }
  0x30   : > { %1197 = vmatpush3.bf16.msra.mxu0 %v1196_v63 }
  0x33   : > { %1150 = vmatmul.mubr.msk.f32.vlgmr.msra.gmra.mrb[6].mxu0 %vm154_vm1, %v1418_v14 }
  0xed   : > { %v224_v15 = vpop.f32.mrb[0].mxu0  ;;  %v295_v17 = vpop.f32.mrb[0].mxu1 }
  0xee   : > { %v228_v16 = vmul.f32 0.25, %v224_v15  ;;  %v1086_v18 = vpop.f32.mrb[1].mxu0  ;;  %v1097_v19 = vpop.f32.mrb[1].mxu1  ;;  %1110 = vmatpush3.xpose.msk.msra.mxu1 %vm369_vm2, %v295_v17 }
  0xef   : > { %1114 = vmatprep.subr.mxu1 %v1315_v11 }
  0xf1   : > { %1112 = vmatmul.mubr.msk.f32.vlgmr.msra.gmra.mrb[2].mxu1 %vm369_vm2, %v228_v16 }
  0xf2   : > { %1116 = vmatprep.mubr.msk.f32.mxu1 %vm1314_vm0, %v1315_v11 }
  0xf6   : > { %v365_v34 = vpop.f32.mrb[2].mxu0 }
  0xf7   : > { %v1108_v35 = vpop.f32.mrb[3].mxu0  ;;  %1115 = vmatpush3.msra.mxu1 %v365_v34 }
  0xf8   : > { %1186 = vmatprep.subr.bf16.mxu1 %v1313_v3 }
  0xfe   : > { %v612_v51 = vpop.f32.mrb[4].mxu0 }
  0xff   : > { %v1129_v52 = vpop.f32.mrb[5].mxu0  ;;  %v616_v56 = vmul.f32 0.25, %v612_v51 }
 0x1c4   : > { %v442_v26 = vpop.f32.mrb[2].mxu1 }
 0x1c5   : > { %v1113_v27 = vpop.f32.mrb[3].mxu1  ;;  %v447_v28 = vsel %vm446_vm3, %v442_v26, -inf }
 0x1c6   : > { %448 = vmax.xlane.f32.xlu0 %v447_v28 }
 0x253   : > { %v449_v29 = vpop.xlane.xlu0 %448 }
 0x254   : > { %v450_v30 = vsub.f32 %v442_v26, %v449_v29 }
 0x256   : > { %v451_v31 = vmul.f32 1.442695, %v450_v30 }
 0x258   : > { %1241 = vpow2.f32 %v451_v31 }
 0x262   : > { %v1242_v32 = vpop.eup %1241 }
 0x263   : > { %v453_v33 = vsel %vm446_vm3, %v1242_v32, 0.0 }
 0x264   : > { %454 = vadd.xlane.f32.xlu0 %v453_v33 }
 0x2f1   : > { %v455_v42 = vpop.xlane.xlu0 %454 }
 0x2f2   : > { %1243 = vrcp.f32 %v455_v42 }
 0x2fc   : > { %v1244_v45 = vpop.eup %1243 }
 0x2fd   : > { %v457_v47 = vmul.f32 %v1244_v45, %v1242_v32 }
 0x2ff   : > { %1117 = vmatmul.mubr.msk.f32.vlgmr.msra.gmra.mrb[4].mxu1 %vm446_vm3, %v457_v47 }
 0x300   : > { %1188 = vmatpush3.bf16.msra.mxu1 %v1187_v46  ;;  %1138 = vmatprep.mubr.msk.f32.mxu1 %vm1314_vm0, %v1315_v11 }
 0x301   : > { %1189 = vmatprep.subr.bf16.mxu1 %v1313_v3  ;;  %v753_v3 = vpop.f32.mrb[6].mxu0 }
 0x302   : > { %v1151_v9 = vpop.f32.mrb[7].mxu0 }
 0x304   : > { %1191 = vmatpush3.bf16.msra.mxu1 %v1190_v50 }
 0x305   : > { %1152 = vmatprep.subr.mxu1 %v1315_v11 }
 0x307   : > { %1139 = vmatmul.mubr.msk.f32.vlgmr.msra.gmra.mrb[6].mxu1 %vm154_vm1, %v1418_v14 }
 0x308   : > { %1154 = vmatprep.mubr.msk.f32.mxu1 %vm1314_vm0, %v1315_v11 }
 0x3d2   : > { %v527_v53 = vpop.f32.mrb[4].mxu1 }
 0x3d3   : > { %v1118_v54 = vpop.f32.mrb[5].mxu1 }
 0x3da   : > { %v683_v55 = vpop.f32.mrb[6].mxu1 }
 0x3db   : > { %v1140_v57 = vpop.f32.mrb[7].mxu1  ;;  %1153 = vmatpush3.xpose.msk.msra.mxu1 %vm369_vm2, %v683_v55 }
 0x3dc   : > { %1157 = vmatprep.subr.mxu1 %v1315_v11 }
 0x3de   : > { %1155 = vmatmul.mubr.msk.f32.vlgmr.msra.gmra.mrb[8].mxu1 %vm369_vm2, %v616_v56 }
 0x3df   : > { %1159 = vmatprep.mubr.msk.f32.mxu1 %vm1314_vm0, %v1315_v11  ;;  %1158 = vmatpush3.msra.mxu1 %v753_v3 }
 0x4b1   : > { %v829_v0 = vpop.f32.mrb[8].mxu1 }
 0x4b2   : > { %v1156_v1 = vpop.f32.mrb[9].mxu1  ;;  %v833_v2 = vsel %vm446_vm3, %v829_v0, -inf }
 0x4b3   : > { %834 = vmax.xlane.f32.xlu1 %v833_v2 }
 0x540   : > { %v835_v4 = vpop.xlane.xlu1 %834 }
 0x541   : > { %v836_v5 = vsub.f32 %v829_v0, %v835_v4 }
 0x543   : > { %v837_v6 = vmul.f32 1.442695, %v836_v5 }
 0x545   : > { %1245 = vpow2.f32 %v837_v6 }
 0x54f   : > { %v1246_v7 = vpop.eup %1245 }
 0x550   : > { %v839_v8 = vsel %vm446_vm3, %v1246_v7, 0.0 }
 0x551   : > { %840 = vadd.xlane.f32.xlu1 %v839_v8 }
 0x5de   : > { %v841_v10 = vpop.xlane.xlu1 %840 }
 0x5df   : > { %1247 = vrcp.f32 %v841_v10 }
 0x5e9   : > { %v1248_v11 = vpop.eup %1247 }
 0x5ea   : > { %v843_v12 = vmul.f32 %v1248_v11, %v1246_v7 }
 0x5ec   : > { %1160 = vmatmul.mubr.msk.f32.vlgmr.msra.gmra.mrb[10].mxu1 %vm446_vm3, %v843_v12 }
 0x6bf   : > { %v913_v13 = vpop.f32.mrb[10].mxu1 }
 0x6c0   : > { %918 = vrot.lane.b32.xlu0 %v913_v13, %s1316_s8  ;;  %v1161_v14 = vpop.f32.mrb[11].mxu1 }
 0x732   : > { %v919_v15 = vpop.permute.xlu0 %918 }
 0x733   : > { %v921_v16 = vsel %vm369_vm2, %v527_v53, %v919_v15 }
 0x734   : > { %922 = vst.msk [vmem:[%s134_s21] sm:$0xff] %vm154_vm1, %v921_v16 }
 0x735   : > { %1262 = shalt.err (!%p1259_p3)
}
 0x736   : > { %s1263_s30 = scalar_lea.hbm %s1523_s25, 128  ;;  %s1267_s5 = scalar_lea.hbm %s1569_s2, 256 }
 0x737   : > { %p1264_p4 = scmp.ne.s32.totalorder %s1523_s25, %s1263_s30  ;;  %p1268_p9 = scmp.lt.u32.totalorder %s1523_s25, %s1569_s2 }
 0x738   : > { %p1269_p10 = scmp.lt.u32.totalorder %s1267_s5, %s1263_s30  ;;  %p1271_p12 = scmp.lt.u32.totalorder %s1263_s30, %s1523_s25 }
 0x739   : > { %p1265_p7 = pnand %p1264_p4, %p1371_p5 }
 0x73a   : > { %p1270_p11 = por %p1269_p10, %p1268_p9 }
 0x73b   : > { %p1266_p8 = pneg %p1265_p7 }
 0x73c   : > { %p1272_p13 = por %p1271_p12, %p1270_p11 }
 0x73e   : > { %p1273_p0 = pnand %p1272_p13, %p1266_p8 }
 0x740   : > { %1276 = shalt.err (!%p1273_p0)
}
 0x741   : > { %1198 = dma.vmem_to_hbm [thread:$0]  (%p1371_p5), %s1525_s22, 128, %s1523_s25, %s924_s26  }
 0x742 PF: > { %p1204_p1 = scmp.ge.s32.totalorder %s1311_s12, 2  ;;  %s949_s8 = sand.u32 1, %s1299_s9  }
 0x743   : > { %s950_s14 = scalar_lea.sflag [#allocation3], %s949_s8 }
 0x744   : > { %p1201_p2 = pnand %p1204_p1, %p1375_p6 }
 0x746   : > { %1294 = dma.done.wait (!%p1201_p2), %s950_s14, 128  }
 0x747   : > { %1296 = vsyncadd (!%p1201_p2), %s950_s14, 4294967168  ;;  %p12_p3 = scmp.ge.s32.totalorder %s1358_s15, 4   ;;  %s1572_s9 = smov %s1303_s10 }
 0x748   : > { %s1573_s10 = smov %s1307_s11  ;;  %s1574_s11 = smov %s1369_s18 }
 0x749   : > { %s1575_s12 = smov %s1358_s15  ;;  %14 = sbr.rel (!%p12_p3) target bundleno = 3 (0x3), region = 68 }
 0x750   :  { %955 = vsyncpa [#allocation3], 1 }
 0x751   :  { %957 = vsyncpa [#allocation3 + $0x1], 1 }

</bundles_post_ra>
